<compile_context>
chip_gen: v7x
topology: tpu7x:2x2x1
jax: 0.10.0
libtpu: 0.0.40
codegen_flags: <defaults>
</compile_context>

<pallas_src>
import functools

import jax
import jax.numpy as jnp
from jax.experimental import pallas as pl
from jax.experimental.pallas import tpu as pltpu

EPS = 0.1
IGNORE_INDEX = -100
_TILE_BYTE_BUDGET = 2 * 1024 * 1024      # ~2 MiB of logits per grid step
_VMEM_CAP_BYTES = 48 * 1024 * 1024       # stays under v7x's 64 MiB physical VMEM


def _make_lsce_kernel(n_rows: int, tn: int, c: int):
    """One (c, tn) class-major tile; emits 3 partial sums per grid step."""

    def kernel(logits_ref, target_ref, part_ref):
        i = pl.program_id(0)

        x = logits_ref[...].astype(jnp.float32)            # (c, tn)
        tgt = target_ref[...]                               # (1, tn) int32

        # Absolute token-row ids for this tile (rows live on lanes).  Padded
        # lanes of a ragged last tile are excluded from every reduction; all
        # masking below uses selects, so garbage/NaN lanes cannot propagate.
        row_ids = i * tn + jax.lax.broadcasted_iota(jnp.int32, (1, tn), 1)
        row_ok = row_ids < n_rows                            # (1, tn) bool

        # --- log-softmax pieces, reduced over the class (sublane) axis ---
        m = jnp.max(x, axis=0, keepdims=True)                # (1, tn)
        shifted = x - m                                      # (c, tn)
        lse = jnp.log(jnp.sum(jnp.exp(shifted), axis=0, keepdims=True))  # (1, tn)

        # Smoothing term per row: -sum_c logp = C*lse - sum_c shifted
        row_smooth = c * lse - jnp.sum(shifted, axis=0, keepdims=True)   # (1, tn)
        smooth_part = jnp.sum(jnp.where(row_ok, row_smooth, 0.0))

        # NLL term: -logp[tgt, n] = lse - shifted[tgt, n]; one boolean select,
        # no float one-hot / full (c, tn) logp temporary.
        cls = jax.lax.broadcasted_iota(jnp.int32, (c, tn), 0)
        gathered = jnp.sum(jnp.where(cls == tgt, shifted, 0.0),
                           axis=0, keepdims=True)                        # (1, tn)
        valid = row_ok & (tgt != IGNORE_INDEX)                           # (1, tn)
        nll_part = jnp.sum(jnp.where(valid, lse - gathered, 0.0))
        count_part = jnp.sum(valid.astype(jnp.float32))

        # Lane-dense partial slot: lane0=smooth_sum, lane1=nll_sum, lane2=count
        lane = jax.lax.broadcasted_iota(jnp.int32, (1, 1, 128), 2)
        part_ref[...] = (jnp.where(lane == 0, smooth_part, 0.0)
                         + jnp.where(lane == 1, nll_part, 0.0)
                         + jnp.where(lane == 2, count_part, 0.0))

    return kernel


def _pick_tile(n: int, c: int, dtype_bytes: int) -> int:
    """Byte-budget row tile (multiple of 128 lanes); grid>=2 for mid-size N."""
    tn = _TILE_BYTE_BUDGET // max(1, c * dtype_bytes)
    tn = max(128, (tn // 128) * 128)
    if tn >= n:
        if n >= 256:
            # Split into (at least) two balanced tiles so the "parallel" grid
            # axis actually shards across both TensorCores on v7x.
            half = (n + 1) // 2
            tn = ((half + 127) // 128) * 128
        else:
            tn = n            # single full-extent tile (block dim == array dim)
    return tn


@functools.partial(jax.jit, static_argnames=("col_tile", "class_major"))
def label_smoothing_cross_entropy(logits, target, col_tile=None,
                                  class_major=False):
    """eps=0.1, reduction='mean', ignore_index=-100 (matches the PyTorch module).

    `logits` is (N, C); pass class_major=True to supply an already class-major
    (C, N) array and skip the wrapper transpose (avoids an extra HBM pass).
    """
    if class_major:
        C, N = logits.shape
        logits_cm = logits                                   # (C, N)
    else:
        N, C = logits.shape
        logits_cm = jnp.transpose(logits, (1, 0))            # (C, N)
    tgt2d = target.astype(jnp.int32).reshape(1, N)
    # NOTE: targets are assumed to be -100 or in [0, C); out-of-range values
    # are silently treated like ignore for the gather (PyTorch would raise).

    dtype_bytes = jnp.dtype(logits.dtype).itemsize
    tn = _pick_tile(N, C, dtype_bytes) if col_tile is None else int(col_tile)
    # Block last dim must be a multiple of 128 (lanes) or the full array dim.
    assert tn == N or tn % 128 == 0, f"col_tile={tn} must be N or a multiple of 128"

    grid = pl.cdiv(N, tn)

    # VMEM budget: double-buffered input tiles + f32 temporaries + headroom,
    # capped safely below v7x's 64 MiB physical VMEM (plenty on v5e/v6e).
    tile_bytes = tn * C * dtype_bytes
    f32_tile_bytes = tn * C * 4
    vmem_limit = int(min(_VMEM_CAP_BYTES,
                         max(16 * 1024 * 1024,
                             2 * (tile_bytes + tn * 4)
                             + 6 * f32_tile_bytes
                             + 4 * 1024 * 1024)))

    parts = pl.pallas_call(
        _make_lsce_kernel(N, tn, C),
        out_shape=jax.ShapeDtypeStruct((grid, 1, 128), jnp.float32),
        grid=(grid,),
        in_specs=[
            pl.BlockSpec((C, tn), lambda i: (0, i)),      # class-major logits tile
            pl.BlockSpec((1, tn), lambda i: (0, i)),      # targets tile
        ],
        out_specs=pl.BlockSpec((1, 1, 128), lambda i: (i, 0, 0)),
        compiler_params=pltpu.CompilerParams(
            dimension_semantics=("parallel",),            # no cross-step carry
            vmem_limit_bytes=vmem_limit,
        ),
    )(logits_cm, tgt2d)

    # Final reduction + combine in plain JAX (trivially cheap; keeps the kernel
    # accumulator-free and isolates the count==0 -> NaN case).
    sums = jnp.sum(parts, axis=(0, 1))                    # (128,)
    smooth_sum, nll_sum, count = sums[0], sums[1], sums[2]
    smooth = smooth_sum / N
    nll = nll_sum / count                                  # 0/0 -> nan, like torch
    return smooth * EPS / C + (1.0 - EPS) * nll


def _reference(logits, target):
    logp = jax.nn.log_softmax(logits.astype(jnp.float32), axis=-1)
    N, C = logits.shape
    smooth = jnp.mean(-jnp.sum(logp, axis=-1))
    valid = target != IGNORE_INDEX
    safe_tgt = jnp.clip(target, 0, C - 1)
    gathered = jnp.take_along_axis(logp, safe_tgt[:, None], axis=1)[:, 0]
    nll = jnp.sum(jnp.where(valid, -gathered, 0.0)) / jnp.sum(valid)
    return smooth * EPS / C + (1.0 - EPS) * nll


if __name__ == "__main__":
    key = jax.random.PRNGKey(0)
    k1, k2, k3, k4, k5, k6, k7, k8 = jax.random.split(key, 8)

    # Case 1: single-tile path (8 token positions, 32 span tags), f32.
    N1, C1 = 8, 32
    logits1 = jax.random.normal(k1, (N1, C1), dtype=jnp.float32)
    tgt1 = jax.random.randint(k2, (N1,), 0, C1, dtype=jnp.int32)
    tgt1 = tgt1.at[3].set(IGNORE_INDEX)                   # exercise ignore_index
    loss1 = jax.block_until_ready(label_smoothing_cross_entropy(logits1, tgt1))
    ref1 = _reference(logits1, tgt1)
    assert jnp.allclose(loss1, ref1, atol=1e-4, rtol=1e-4), (loss1, ref1)

    # Case 2: auto tile selection splits N=512 into 2 balanced 256-row tiles
    # (grid=2 -> megacore-shardable "parallel" axis), f32.
    N2, C2 = 512, 32
    logits2 = jax.random.normal(k3, (N2, C2), dtype=jnp.float32)
    tgt2 = jax.random.randint(k4, (N2,), 0, C2, dtype=jnp.int32)
    tgt2 = tgt2.at[0].set(IGNORE_INDEX).at[17].set(IGNORE_INDEX).at[511].set(IGNORE_INDEX)
    loss2 = jax.block_until_ready(label_smoothing_cross_entropy(logits2, tgt2))
    ref2 = _reference(logits2, tgt2)
    assert jnp.allclose(loss2, ref2, atol=1e-4, rtol=1e-4), (loss2, ref2)

    # Case 3: forced 128-row tile with a ragged last tile (300 = 2*128 + 44), f32.
    N3, C3 = 300, 32
    logits3 = jax.random.normal(k5, (N3, C3), dtype=jnp.float32)
    tgt3 = jax.random.randint(k6, (N3,), 0, C3, dtype=jnp.int32)
    tgt3 = tgt3.at[0].set(IGNORE_INDEX)
    loss3 = jax.block_until_ready(
        label_smoothing_cross_entropy(logits3, tgt3, col_tile=128))
    ref3 = _reference(logits3, tgt3)
    assert jnp.allclose(loss3, ref3, atol=1e-4, rtol=1e-4), (loss3, ref3)

    # Case 4: bf16 logits supplied pre-transposed (class_major=True), ragged grid.
    N4, C4 = 260, 32
    logits4 = jax.random.normal(k7, (N4, C4), dtype=jnp.float32).astype(jnp.bfloat16)
    tgt4 = jax.random.randint(k8, (N4,), 0, C4, dtype=jnp.int32)
    tgt4 = tgt4.at[5].set(IGNORE_INDEX)
    loss4 = jax.block_until_ready(
        label_smoothing_cross_entropy(jnp.transpose(logits4), tgt4,
                                      col_tile=128, class_major=True))
    ref4 = _reference(logits4, tgt4)
    assert jnp.allclose(loss4, ref4, atol=1e-3, rtol=1e-3), (loss4, ref4)

    print("KERNEL_OK")
</pallas_src>

<mosaic_0001>
module attributes {stable_mosaic.version = 11 : i64} {
  func.func @kernel(%arg0: i32, %arg1: memref<32x8xf32, #tpu.memory_space<vmem>>, %arg2: memref<1x8xi32, #tpu.memory_space<vmem>>, %arg3: memref<1x1x128xf32, #tpu.memory_space<vmem>>) attributes {dimension_semantics = [#tpu.dimension_semantics<parallel>], iteration_bounds = array<i64: 1>, scalar_prefetch = 0 : i64, scratch_operands = 0 : i64, tpu.core_type = #tpu.core_type<tc>, window_params = [{transform_indices = @transform_0, window_bounds = array<i64: 32, 8>}, {transform_indices = @transform_1, window_bounds = array<i64: 1, 8>}, {transform_indices = @transform_2, window_bounds = array<i64: 1, 1, 128>}]} {
    %c0 = arith.constant 0 : index
    %c0_0 = arith.constant 0 : index
    %0 = vector.load %arg1[%c0, %c0_0] : memref<32x8xf32, #tpu.memory_space<vmem>>, vector<32x8xf32>
    %c0_1 = arith.constant 0 : index
    %c0_2 = arith.constant 0 : index
    %1 = vector.load %arg2[%c0_1, %c0_2] : memref<1x8xi32, #tpu.memory_space<vmem>>, vector<1x8xi32>
    %c8_i32 = arith.constant 8 : i32
    %2 = arith.muli %arg0, %c8_i32 : i32
    %3 = tpu.iota {dimensions = array<i32: 1>} : vector<1x8xi32>
    %4 = vector.broadcast %2 : i32 to vector<1x8xi32>
    %5 = arith.addi %4, %3 : vector<1x8xi32>
    %c8_i32_3 = arith.constant 8 : i32
    %6 = vector.broadcast %c8_i32_3 : i32 to vector<1x8xi32>
    %7 = arith.cmpi slt, %5, %6 : vector<1x8xi32>
    %cst = arith.constant dense<0xFF800000> : vector<8xf32>
    %8 = vector.multi_reduction <maximumf>, %0, %cst [0] : vector<32x8xf32> to vector<8xf32>
    %9 = vector.shape_cast %8 : vector<8xf32> to vector<1x8xf32>
    %10 = vector.broadcast %9 : vector<1x8xf32> to vector<32x8xf32>
    %11 = arith.subf %0, %10 : vector<32x8xf32>
    %12 = math.exp %11 : vector<32x8xf32>
    %cst_4 = arith.constant dense<0.000000e+00> : vector<8xf32>
    %13 = vector.multi_reduction <add>, %12, %cst_4 [0] : vector<32x8xf32> to vector<8xf32>
    %14 = vector.shape_cast %13 : vector<8xf32> to vector<1x8xf32>
    %15 = math.log %14 : vector<1x8xf32>
    %cst_5 = arith.constant 3.200000e+01 : f32
    %16 = vector.broadcast %cst_5 : f32 to vector<1x8xf32>
    %17 = arith.mulf %16, %15 : vector<1x8xf32>
    %cst_6 = arith.constant dense<0.000000e+00> : vector<8xf32>
    %18 = vector.multi_reduction <add>, %11, %cst_6 [0] : vector<32x8xf32> to vector<8xf32>
    %19 = vector.shape_cast %18 : vector<8xf32> to vector<1x8xf32>
    %20 = arith.subf %17, %19 : vector<1x8xf32>
    %cst_7 = arith.constant 0.000000e+00 : f32
    %21 = vector.broadcast %cst_7 : f32 to vector<1x8xf32>
    %22 = arith.select %7, %20, %21 : vector<1x8xi1>, vector<1x8xf32>
    %23 = vector.shape_cast %22 : vector<1x8xf32> to vector<1x1x8xf32>
    %cst_8 = arith.constant dense<0.000000e+00> : vector<1xf32>
    %24 = vector.multi_reduction <add>, %23, %cst_8 [1, 2] : vector<1x1x8xf32> to vector<1xf32>
    %25 = vector.shape_cast %24 : vector<1xf32> to vector<1x1x1xf32>
    %26 = vector.extract %25[0, 0, 0] : f32 from vector<1x1x1xf32>
    %27 = tpu.iota {dimensions = array<i32: 0>} : vector<32x8xi32>
    %28 = vector.broadcast %1 : vector<1x8xi32> to vector<32x8xi32>
    %29 = arith.cmpi eq, %27, %28 : vector<32x8xi32>
    %cst_9 = arith.constant 0.000000e+00 : f32
    %30 = vector.broadcast %cst_9 : f32 to vector<32x8xf32>
    %31 = arith.select %29, %11, %30 : vector<32x8xi1>, vector<32x8xf32>
    %cst_10 = arith.constant dense<0.000000e+00> : vector<8xf32>
    %32 = vector.multi_reduction <add>, %31, %cst_10 [0] : vector<32x8xf32> to vector<8xf32>
    %33 = vector.shape_cast %32 : vector<8xf32> to vector<1x8xf32>
    %c-100_i32 = arith.constant -100 : i32
    %34 = vector.broadcast %c-100_i32 : i32 to vector<1x8xi32>
    %35 = arith.cmpi ne, %1, %34 : vector<1x8xi32>
    %36 = arith.andi %7, %35 : vector<1x8xi1>
    %37 = arith.subf %15, %33 : vector<1x8xf32>
    %cst_11 = arith.constant 0.000000e+00 : f32
    %38 = vector.broadcast %cst_11 : f32 to vector<1x8xf32>
    %39 = arith.select %36, %37, %38 : vector<1x8xi1>, vector<1x8xf32>
    %40 = vector.shape_cast %39 : vector<1x8xf32> to vector<1x1x8xf32>
    %cst_12 = arith.constant dense<0.000000e+00> : vector<1xf32>
    %41 = vector.multi_reduction <add>, %40, %cst_12 [1, 2] : vector<1x1x8xf32> to vector<1xf32>
    %42 = vector.shape_cast %41 : vector<1xf32> to vector<1x1x1xf32>
    %43 = vector.extract %42[0, 0, 0] : f32 from vector<1x1x1xf32>
    %44 = arith.extui %36 : vector<1x8xi1> to vector<1x8xi32>
    %45 = arith.sitofp %44 : vector<1x8xi32> to vector<1x8xf32>
    %46 = vector.shape_cast %45 : vector<1x8xf32> to vector<1x1x8xf32>
    %cst_13 = arith.constant dense<0.000000e+00> : vector<1xf32>
    %47 = vector.multi_reduction <add>, %46, %cst_13 [1, 2] : vector<1x1x8xf32> to vector<1xf32>
    %48 = vector.shape_cast %47 : vector<1xf32> to vector<1x1x1xf32>
    %49 = vector.extract %48[0, 0, 0] : f32 from vector<1x1x1xf32>
    %50 = tpu.iota {dimensions = array<i32: 2>} : vector<1x1x128xi32>
    %c0_i32 = arith.constant 0 : i32
    %51 = vector.broadcast %c0_i32 : i32 to vector<1x1x128xi32>
    %52 = arith.cmpi eq, %50, %51 : vector<1x1x128xi32>
    %cst_14 = arith.constant 0.000000e+00 : f32
    %53 = vector.broadcast %26 : f32 to vector<1x1x128xf32>
    %54 = vector.broadcast %cst_14 : f32 to vector<1x1x128xf32>
    %55 = arith.select %52, %53, %54 : vector<1x1x128xi1>, vector<1x1x128xf32>
    %c1_i32 = arith.constant 1 : i32
    %56 = vector.broadcast %c1_i32 : i32 to vector<1x1x128xi32>
    %57 = arith.cmpi eq, %50, %56 : vector<1x1x128xi32>
    %cst_15 = arith.constant 0.000000e+00 : f32
    %58 = vector.broadcast %43 : f32 to vector<1x1x128xf32>
    %59 = vector.broadcast %cst_15 : f32 to vector<1x1x128xf32>
    %60 = arith.select %57, %58, %59 : vector<1x1x128xi1>, vector<1x1x128xf32>
    %61 = arith.addf %55, %60 : vector<1x1x128xf32>
    %c2_i32 = arith.constant 2 : i32
    %62 = vector.broadcast %c2_i32 : i32 to vector<1x1x128xi32>
    %63 = arith.cmpi eq, %50, %62 : vector<1x1x128xi32>
    %cst_16 = arith.constant 0.000000e+00 : f32
    %64 = vector.broadcast %49 : f32 to vector<1x1x128xf32>
    %65 = vector.broadcast %cst_16 : f32 to vector<1x1x128xf32>
    %66 = arith.select %63, %64, %65 : vector<1x1x128xi1>, vector<1x1x128xf32>
    %67 = arith.addf %61, %66 : vector<1x1x128xf32>
    %c0_17 = arith.constant 0 : index
    %c0_18 = arith.constant 0 : index
    %c0_19 = arith.constant 0 : index
    %68 = vector.load %arg3[%c0_17, %c0_18, %c0_19] : memref<1x1x128xf32, #tpu.memory_space<vmem>>, vector<1x1x128xf32>
    tpu.vector_store %arg3[%c0_17, %c0_18, %c0_19], %67 {strides = array<i32>} : memref<1x1x128xf32, #tpu.memory_space<vmem>>, vector<1x1x128xf32>,
    return
  }
  func.func @transform_0(%arg0: i32) -> (i32, i32) {
    %c0_i32 = arith.constant 0 : i32
    %c0_i32_0 = arith.constant 0 : i32
    return %c0_i32, %arg0 : i32, i32
  }
  func.func @transform_1(%arg0: i32) -> (i32, i32) {
    %c0_i32 = arith.constant 0 : i32
    %c0_i32_0 = arith.constant 0 : i32
    return %c0_i32, %arg0 : i32, i32
  }
  func.func @transform_2(%arg0: i32) -> (i32, i32, i32) {
    %c0_i32 = arith.constant 0 : i32
    %c0_i32_0 = arith.constant 0 : i32
    %c0_i32_1 = arith.constant 0 : i32
    return %arg0, %c0_i32, %c0_i32_0 : i32, i32, i32
  }
}

</mosaic_0001>

<bundles_post_ra>
// kernel: label_smoothing_cross_entropy.1
= control target key start
LH: loop header
LB: loop body
LE: loop exit
PB: predicated region body
PF: predicated region fallthrough
CT: control target
= control target key end

     0   :  { %v17_v0 = vlaneseq  ;;  %vm22_vm0 = vcmask 64512   ;;  %vm79_vm3 = vcmask 57344   ;;  %v180_v14 = vmov 0.0   ;;  %s251_s1 = inlined_call_operand.vmem [shape: s32[1,8], index: 1, kind: input, shape index: {}]   ;;  %s252_s0 = inlined_call_operand.vmem [shape: f32[32,8], index: 0, kind: input, shape index: {}]   ;;  %s253_s2 = inlined_call_operand.vmem [shape: f32[1,1,128], index: 2, kind: output, shape index: {}]  }
   0x1   :  { %v15_v1 = vld [vmem:[%s251_s1] sm:$0x1]  ;;  %v12_v3 = vld [vmem:[%s252_s0 + $0x8] sm:$0xff]  ;;  %v13_v5 = vld [vmem:[%s252_s0 + $0x10] sm:$0xff] }
   0x2   :  { %v11_v2 = vld [vmem:[%s252_s0] sm:$0xff]  ;;  %v205_v4 = vand.u32 127, %v17_v0  ;;  %vm120_vm1 = vcmp.ne.s32.totalorder %v15_v1, 4294967196  ;;  %v14_v6 = vld [vmem:[%s252_s0 + $0x18] sm:$0xff]  ;;  %v24_v8 = vsel %vm22_vm0, %v12_v3, -inf  ;;  %v25_v9 = vsel %vm22_vm0, %v13_v5, -inf }
   0x3   :  { %v23_v7 = vsel %vm22_vm0, %v11_v2, -inf  ;;  %v26_v10 = vsel %vm22_vm0, %v14_v6, -inf  ;;  %v91_v20 = vshrl.u32 %v17_v0, 7 }
   0x4   :  { %vm21_vm2 = vcmp.lt.s32.totalorder %v205_v4, 8  ;;  %v27_v12 = vmax.f32 %v23_v7, %v24_v8  ;;  %v28_v13 = vmax.f32 %v25_v9, %v26_v10  ;;  %vm146_vm9 = vcmp.eq.s32.totalorder %v205_v4, 0 }
   0x5   :  { %vm220_vm4 = vmand %vm21_vm2, %vm120_vm1  ;;  %v97_v23 = vsub.s32 0, %v91_v20  ;;  %v92_v26 = vadd.s32 8, %v91_v20  ;;  %v93_v35 = vadd.s32 16, %v91_v20  ;;  %v94_v39 = vadd.s32 24, %v91_v20 }
   0x6   :  { %v162_v15 = vsel %vm220_vm4, 1.0, %v180_v14  ;;  %v29_v17 = vmax.f32 %v27_v12, %v28_v13  ;;  %vm149_vm10 = vcmp.eq.s32.totalorder %v205_v4, 1  ;;  %vm153_vm11 = vcmp.eq.s32.totalorder %v205_v4, 2 }
   0x7   :  { %v136_v16 = vsel %vm79_vm3, %v162_v15, 0.0  ;;  %v98_v27 = vrot.slane %v15_v1, %v97_v23 }
   0x8   :  { %137 = vadd.xlane.f32.xlu1 %v136_v16  ;;  %v30_v18 = vrot.slane %v29_v17, 4 }
   0x9   :  { %vm99_vm5 = vcmp.eq.s32.totalorder %v91_v20, %v98_v27  ;;  %vm100_vm6 = vcmp.eq.s32.totalorder %v92_v26, %v98_v27  ;;  %vm101_vm7 = vcmp.eq.s32.totalorder %v93_v35, %v98_v27  ;;  %vm102_vm8 = vcmp.eq.s32.totalorder %v94_v39, %v98_v27 }
   0xa   :  { %v31_v19 = vmax.f32 %v29_v17, %v30_v18 }
   0xc   :  { %v32_v21 = vrot.slane %v31_v19, 2 }
   0xe   :  { %v33_v22 = vmax.f32 %v31_v19, %v32_v21 }
  0x10   :  { %v34_v24 = vrot.slane %v33_v22, 1 }
  0x12   :  { %v35_v25 = vmax.f32 %v33_v22, %v34_v24 }
  0x14   :  { %v36_v28 = vsub.f32 %v11_v2, %v35_v25  ;;  %v37_v29 = vsub.f32 %v12_v3, %v35_v25  ;;  %v38_v30 = vsub.f32 %v13_v5, %v35_v25  ;;  %v39_v31 = vsub.f32 %v14_v6, %v35_v25 }
  0x16   :  { %v40_v32 = vmul.f32 1.442695, %v36_v28  ;;  %v42_v33 = vmul.f32 1.442695, %v37_v29  ;;  %v44_v34 = vmul.f32 1.442695, %v38_v30 }
  0x17   :  { %v46_v36 = vmul.f32 1.442695, %v39_v31  ;;  %v103_v37 = vsel %vm99_vm5, %v36_v28, 0.0  ;;  %v104_v38 = vsel %vm100_vm6, %v37_v29, 0.0  ;;  %v105_v42 = vsel %vm101_vm7, %v38_v30, 0.0 }
  0x18   :  { %170 = vpow2.f32 %v40_v32  ;;  %v107_v40 = vsel %vm22_vm0, %v103_v37, 0.0  ;;  %v108_v41 = vsel %vm22_vm0, %v104_v38, 0.0  ;;  %v64_v43 = vsel %vm22_vm0, %v36_v28, 0.0 }
  0x19   :  { %172 = vpow2.f32 %v42_v33  ;;  %v65_v44 = vsel %vm22_vm0, %v37_v29, 0.0  ;;  %v109_v45 = vadd.f32 %v108_v41, %v107_v40  ;;  %v110_v46 = vsel %vm22_vm0, %v105_v42, 0.0 }
  0x1a   :  { %174 = vpow2.f32 %v44_v34  ;;  %v66_v48 = vadd.f32 %v65_v44, %v64_v43  ;;  %v106_v49 = vsel %vm102_vm8, %v39_v31, 0.0  ;;  %v67_v52 = vsel %vm22_vm0, %v38_v30, 0.0 }
  0x1b   :  { %176 = vpow2.f32 %v46_v36  ;;  %v111_v55 = vadd.f32 %v110_v46, %v109_v45  ;;  %v112_v59 = vsel %vm22_vm0, %v106_v49, 0.0  ;;  %v69_v63 = vsel %vm22_vm0, %v39_v31, 0.0 }
  0x1c   :  { %v68_v61 = vadd.f32 %v67_v52, %v66_v48 }
  0x1d   :  { %v113_v0 = vadd.f32 %v112_v59, %v111_v55 }
  0x1e   :  { %v70_v2 = vadd.f32 %v69_v63, %v68_v61 }
  0x1f   :  { %v114_v5 = vrot.slane %v113_v0, 4 }
  0x20   :  { %v71_v7 = vrot.slane %v70_v2, 4 }
  0x21   :  { %v115_v9 = vadd.f32 %v114_v5, %v113_v0 }
  0x22   :  { %v171_v47 = vpop.eup %170  ;;  %v72_v12 = vadd.f32 %v71_v7, %v70_v2 }
  0x23   :  { %v173_v50 = vpop.eup %172  ;;  %v48_v51 = vsel %vm22_vm0, %v171_v47, 0.0  ;;  %v116_v14 = vrot.slane %v115_v9, 2 }
  0x24   :  { %v175_v53 = vpop.eup %174  ;;  %v49_v54 = vsel %vm22_vm0, %v173_v50, 0.0  ;;  %v73_v16 = vrot.slane %v72_v12, 2 }
  0x25   :  { %v177_v56 = vpop.eup %176  ;;  %v50_v57 = vadd.f32 %v49_v54, %v48_v51  ;;  %v51_v58 = vsel %vm22_vm0, %v175_v53, 0.0  ;;  %v117_v17 = vadd.f32 %v116_v14, %v115_v9 }
  0x26   :  { %v53_v60 = vsel %vm22_vm0, %v177_v56, 0.0  ;;  %v74_v18 = vadd.f32 %v73_v16, %v72_v12 }
  0x27   :  { %v52_v62 = vadd.f32 %v51_v58, %v50_v57  ;;  %v118_v19 = vrot.slane %v117_v17, 1 }
  0x28   :  { %v75_v20 = vrot.slane %v74_v18, 1 }
  0x29   :  { %v54_v1 = vadd.f32 %v53_v60, %v52_v62  ;;  %v119_v21 = vadd.f32 %v118_v19, %v117_v17 }
  0x2a   :  { %v76_v24 = vadd.f32 %v75_v20, %v74_v18 }
  0x2b   :  { %v55_v3 = vrot.slane %v54_v1, 4 }
  0x2d   :  { %v56_v6 = vadd.f32 %v55_v3, %v54_v1 }
  0x2f   :  { %v57_v8 = vrot.slane %v56_v6, 2 }
  0x31   :  { %v58_v10 = vadd.f32 %v57_v8, %v56_v6 }
  0x33   :  { %v59_v13 = vrot.slane %v58_v10, 1 }
  0x35   :  { %v60_v15 = vadd.f32 %v59_v13, %v58_v10 }
  0x37   :  { %178 = vlog2.f32 %v60_v15 }
  0x41   :  { %v179_v22 = vpop.eup %178 }
  0x42   :  { %v62_v23 = vmul.f32 0.6931472, %v179_v22 }
  0x44   :  { %v63_v25 = vmul.f32 32.0, %v62_v23  ;;  %v122_v26 = vsub.f32 %v62_v23, %v119_v21 }
  0x46   :  { %v77_v27 = vsub.f32 %v63_v25, %v76_v24  ;;  %v123_v29 = vsel %vm220_vm4, %v122_v26, 0.0 }
  0x47   :  { %v124_v31 = vsel %vm79_vm3, %v123_v29, 0.0 }
  0x48   :  { %v78_v28 = vsel %vm21_vm2, %v77_v27, 0.0 }
  0x49   :  { %v80_v30 = vsel %vm79_vm3, %v78_v28, 0.0 }
  0x4a   :  { %81 = vadd.xlane.f32.xlu0 %v80_v30 }
  0x4e   :  { %125 = vadd.xlane.f32.xlu0 %v124_v31 }
  0x95   :  { %v138_v32 = vpop.xlane.xlu1 %137 }
  0x96   :  { %v139_v33 = vrot.slane %v138_v32, 4 }
  0x98   :  { %v140_v34 = vadd.f32 %v139_v33, %v138_v32 }
  0x9a   :  { %v141_v38 = vrot.slane %v140_v34, 2 }
  0x9c   :  { %v142_v11 = vadd.f32 %v141_v38, %v140_v34 }
  0x9e   :  { %v143_v48 = vrot.slane %v142_v11, 1 }
  0xa0   :  { %v144_v51 = vadd.f32 %v143_v48, %v142_v11 }
  0xd7   :  { %v82_v35 = vpop.xlane.xlu0 %81 }
  0xd8   :  { %v83_v36 = vrot.slane %v82_v35, 4 }
  0xda   :  { %v84_v37 = vadd.f32 %v83_v36, %v82_v35 }
  0xdb   :  { %v126_v39 = vpop.xlane.xlu0 %125 }
  0xdc   :  { %v85_v40 = vrot.slane %v84_v37, 2  ;;  %v127_v41 = vrot.slane %v126_v39, 4 }
  0xde   :  { %v128_v42 = vadd.f32 %v127_v41, %v126_v39  ;;  %v86_v43 = vadd.f32 %v85_v40, %v84_v37 }
  0xe0   :  { %v129_v44 = vrot.slane %v128_v42, 2  ;;  %v87_v45 = vrot.slane %v86_v43, 1 }
  0xe2   :  { %v130_v46 = vadd.f32 %v129_v44, %v128_v42  ;;  %v88_v47 = vadd.f32 %v87_v45, %v86_v43 }
  0xe4   :  { %163 = vpush %v88_v47  ;;  %v131_v49 = vrot.slane %v130_v46, 1 }
  0xe6   :  { %v132_v50 = vadd.f32 %v131_v49, %v130_v46 }
  0xe8   :  { %165 = vpush %v132_v50 }
  0xe9   :  { %167 = vpush %v144_v51 }
 0x115   :  { %s164_s0 = spop %163 }
 0x116   :  { %v147_v52 = vstv %s164_s0 }
 0x117   :  { %v148_v54 = vsel %vm146_vm9, %v147_v52, 0.0 }
 0x119   :  { %s166_s1 = spop %165 }
 0x11a   :  { %v150_v53 = vstv %s166_s1  ;;  %s168_s19 = spop %167 }
 0x11b   :  { %v151_v55 = vsel %vm149_vm10, %v150_v53, 0.0  ;;  %v154_v56 = vstv %s168_s19 }
 0x11c   :  { %v152_v57 = vadd.f32 %v151_v55, %v148_v54  ;;  %v155_v58 = vsel %vm153_vm11, %v154_v56, 0.0 }
 0x11e   :  { %v156_v59 = vadd.f32 %v155_v58, %v152_v57 }
 0x120   :  { %157 = vst [vmem:[%s253_s2] sm:$0x1] %v156_v59 }

</bundles_post_ra>
